<compile_context>
chip_gen: v7x
topology: tpu7x:2x2x1
jax: 0.10.0
libtpu: 0.0.40
codegen_flags: <defaults>
</compile_context>

<pallas_src>
import functools

import jax
import jax.numpy as jnp
from jax import lax
from jax.experimental import pallas as pl
from jax.experimental.pallas import tpu as pltpu

LANE = 128
F32 = jnp.float32
BF16 = jnp.bfloat16


def _ru(x, m):
    return (x + m - 1) // m * m


def _pad2(a, rows, cols):
    return jnp.pad(a, ((0, rows - a.shape[0]), (0, cols - a.shape[1])))


# ---------------------------------------------------------------------------
# Kernel 1: node-side precompute  ->  [ h_node | gate_node ]  (bf16)
# ---------------------------------------------------------------------------
def _node_side_kernel(x_ref, nt_ref,
                      w1f_ref, b1n_ref, w2n_ref, b2n_ref,
                      w1gt_ref, b1g_ref,
                      ns_ref):
    hp = w2n_ref.shape[0]
    x = x_ref[...].astype(BF16)                                    # (tN, Dn)
    # Fused shared-LHS matmul: x @ [w1n | w1g_x]  ->  (tN, 2*Hp)
    z = jnp.dot(x, w1f_ref[...], preferred_element_type=F32)
    h = jnp.maximum(z[:, :hp] + b1n_ref[...], 0.0).astype(BF16)
    h_node = jnp.dot(h, w2n_ref[...], preferred_element_type=F32) + b2n_ref[...]
    gate_node = z[:, hp:] + nt_ref[...] * w1gt_ref[...] + b1g_ref[...]
    # Write the two halves directly (no lane-dim concat temporary).
    ns_ref[:, :hp] = h_node.astype(BF16)
    ns_ref[:, hp:] = gate_node.astype(BF16)


# ---------------------------------------------------------------------------
# Kernel 2: edge-tiled message / gate + windowed scatter-sum into compacted rows
# ---------------------------------------------------------------------------
def _edge_kernel(ws_ref,                       # scalar-prefetch: per-tile window start
                 ea_ref, ns_ref, rank_ref,
                 w1ef_ref, b1e_ref, w2e_ref, b2e_ref,
                 wm_ref, bm_ref, w2g_ref, b2g_ref,
                 aggr_ref, *, window):
    t = pl.program_id(0)

    @pl.when(t == 0)
    def _init():
        aggr_ref[...] = jnp.zeros_like(aggr_ref)

    hp = aggr_ref.shape[1]
    ea = ea_ref[...]                                               # (tE, De) bf16
    ns = ns_ref[...]                                               # (tE, 2*Hp) bf16
    h_node_col = ns[:, :hp]
    gate_node = ns[:, hp:].astype(F32)

    # Fused shared-LHS matmul: ea @ [w1e | w1g_e]  ->  (tE, 2*Hp)
    eg = jnp.dot(ea, w1ef_ref[...], preferred_element_type=F32)
    h = jnp.maximum(eg[:, :hp] + b1e_ref[...], 0.0).astype(BF16)
    h_edge = jnp.dot(h, w2e_ref[...], preferred_element_type=F32) + b2e_ref[...]

    # message + gate
    prod = (h_edge * h_node_col.astype(F32)).astype(BF16)
    msg = jnp.dot(prod, wm_ref[...], preferred_element_type=F32) + bm_ref[...]
    g1 = jnp.maximum(eg[:, hp:] + gate_node, 0.0).astype(BF16)
    gate = jnp.dot(g1, w2g_ref[...], preferred_element_type=F32) + b2g_ref[...]
    msg = msg * jax.nn.sigmoid(gate)                               # (tE, Hp) f32

    # Windowed scatter-sum: edges are row-sorted + rank-compacted, so this tile's
    # ranks all fall inside [ws, ws + window).  Padded edges carry an out-of-window
    # rank and contribute an all-zero one-hot column.
    ws = pl.multiple_of(ws_ref[t], 8)
    local = rank_ref[...] - ws                                     # (1, tE)
    t_e = ea.shape[0]
    oh = (lax.broadcasted_iota(jnp.int32, (window, t_e), 0) == local).astype(BF16)
    upd = jnp.dot(oh, msg.astype(BF16), preferred_element_type=F32)  # (window, Hp)
    cur = aggr_ref[pl.ds(ws, window), :]
    aggr_ref[pl.ds(ws, window), :] = cur + upd


# ---------------------------------------------------------------------------
# Kernel 3: node-tiled epilogue (centroid linear + LayerNorm + ReLU + out transform)
# ---------------------------------------------------------------------------
def _epilogue_kernel(x_ref, aggr_ref,
                     wc_ref, bc_ref, gamma_ref, beta_ref, wo_ref, bo_ref,
                     out_ref, *, true_hidden):
    hp = wc_ref.shape[1]
    x = x_ref[...].astype(BF16)
    pre = (jnp.dot(x, wc_ref[...], preferred_element_type=F32)
           + bc_ref[...] + aggr_ref[...])                          # (tN, Hp) f32
    # LayerNorm over the TRUE hidden width (padded columns of `pre` are exactly 0).
    inv_h = 1.0 / float(true_hidden)
    mean = jnp.sum(pre, axis=-1, keepdims=True) * inv_h
    mask = (lax.broadcasted_iota(jnp.int32, (1, hp), 1) < true_hidden).astype(F32)
    diff = (pre - mean) * mask
    var = jnp.sum(diff * diff, axis=-1, keepdims=True) * inv_h
    y = diff * lax.rsqrt(var + 1e-5) * gamma_ref[...] + beta_ref[...]
    y = jnp.maximum(y, 0.0).astype(BF16)
    out_ref[...] = jnp.dot(y, wo_ref[...], preferred_element_type=F32) + bo_ref[...]


# ---------------------------------------------------------------------------
# Wrapper
# ---------------------------------------------------------------------------
def node_block_forward(x, edge_index, edge_attr, node_time, params, *, tile_e=512):
    (w1n, b1n, w2n, b2n, w1e, b1e, w2e, b2e, wm, bm,
     w1g_e, w1g_x, w1g_t, b1g, w2g, b2g, wc, bc, gamma, beta, wo, bo) = params

    N, node_dim = x.shape
    E, edge_dim = edge_attr.shape
    H = w1n.shape[1]

    Dn, De, Hp = _ru(node_dim, LANE), _ru(edge_dim, LANE), _ru(H, LANE)
    if N <= 1024:
        tN = Np = _ru(N, 8)
    else:
        tN = 512
        Np = _ru(N, tN)
    tE = min(tile_e, _ru(E, LANE))
    Ep = _ru(E, tE)
    n_tiles = Ep // tE
    WIN = tE + 8                       # rank window per edge tile (ranks are compacted)
    Npc = max(Np, WIN)                 # compacted-accumulator rows (multiple of 8)

    # ---- edge preprocessing: sort by destination row, compact rows to dense ranks ----
    row = edge_index[0].astype(jnp.int32)
    col = edge_index[1].astype(jnp.int32)
    order = jnp.argsort(row)
    row_s = row[order]
    col_s = col[order]
    ea_s = edge_attr[order]

    new_flag = jnp.concatenate(
        [jnp.ones((1,), jnp.int32), (row_s[1:] != row_s[:-1]).astype(jnp.int32)])
    rank = jnp.cumsum(new_flag) - 1                                # (E,) dense row rank

    BIG = Npc + WIN                                                # out-of-window sentinel
    rank_p = jnp.full((Ep,), BIG, jnp.int32).at[:E].set(rank)
    col_p = jnp.zeros((Ep,), jnp.int32).at[:E].set(col_s)
    ea_p = _pad2(ea_s.astype(F32), Ep, De).astype(BF16)

    # Per-tile window start (8-aligned, clamped so the window stays in-bounds).
    first_rank = rank_p[0::tE]                                     # (n_tiles,)
    win_start = jnp.minimum((first_rank // 8) * 8, Npc - WIN).astype(jnp.int32)
    rank2d = rank_p.reshape(1, Ep)

    # rank -> node-row mapping (nodes without incoming edges point at a zero row).
    rank_of_node = jnp.full((Np,), Npc - 1, jnp.int32).at[row_s].set(rank)

    # ---- padded / cast node inputs & weights ----
    x_p = _pad2(x.astype(F32), Np, Dn)
    nt_p = _pad2(node_time.astype(F32), Np, 1)

    wb = lambda w: w.astype(BF16)
    w1f_p = wb(jnp.concatenate([_pad2(w1n, Dn, Hp), _pad2(w1g_x, Dn, Hp)], axis=1))
    b1n_p = _pad2(b1n, 1, Hp)
    w2n_p, b2n_p = wb(_pad2(w2n, Hp, Hp)), _pad2(b2n, 1, Hp)
    w1gt_p = _pad2(w1g_t, 1, Hp)
    b1g_p = _pad2(b1g, 1, Hp)

    w1ef_p = wb(jnp.concatenate([_pad2(w1e, De, Hp), _pad2(w1g_e, De, Hp)], axis=1))
    b1e_p = _pad2(b1e, 1, Hp)
    w2e_p, b2e_p = wb(_pad2(w2e, Hp, Hp)), _pad2(b2e, 1, Hp)
    wm_p, bm_p = wb(_pad2(wm, Hp, Hp)), _pad2(bm, 1, Hp)
    w2g_p, b2g_p = wb(_pad2(w2g, Hp, Hp)), _pad2(b2g, 1, Hp)

    wc_p, bc_p = wb(_pad2(wc, Dn, Hp)), _pad2(bc, 1, Hp)
    gamma_p, beta_p = _pad2(gamma, 1, Hp), _pad2(beta, 1, Hp)
    wo_p, bo_p = wb(_pad2(wo, Hp, Dn)), _pad2(bo, 1, Dn)

    vmem = 48 * 1024 * 1024   # safe on all of v5e/v6e/v7x; could be ~96 MiB on v5e/v6e

    # ---- kernel 1: node-side precompute ----
    full_n = lambda shape: pl.BlockSpec(shape, lambda i: (0, 0))
    node_side = pl.pallas_call(
        _node_side_kernel,
        out_shape=jax.ShapeDtypeStruct((Np, 2 * Hp), BF16),
        grid=(Np // tN,),
        in_specs=[
            pl.BlockSpec((tN, Dn), lambda i: (i, 0)),
            pl.BlockSpec((tN, 1), lambda i: (i, 0)),
            full_n((Dn, 2 * Hp)), full_n((1, Hp)),
            full_n((Hp, Hp)), full_n((1, Hp)),
            full_n((1, Hp)), full_n((1, Hp)),
        ],
        out_specs=pl.BlockSpec((tN, 2 * Hp), lambda i: (i, 0)),
        compiler_params=pltpu.CompilerParams(
            dimension_semantics=("parallel",), vmem_limit_bytes=vmem),
    )(x_p, nt_p, w1f_p, b1n_p, w2n_p, b2n_p, w1gt_p, b1g_p)

    # XLA row gather of the node-side tensor (pure O(E*H) data movement).
    ns_e = jnp.take(node_side, col_p, axis=0)                      # (Ep, 2*Hp) bf16

    # ---- kernel 2: edge message / gate / windowed scatter ----
    flops = int(2 * Ep * (2 * Hp * De + 3 * Hp * Hp + WIN * Hp))
    bytes_accessed = int(ea_p.size * 2 + ns_e.size * 2 + rank2d.size * 4
                         + Npc * Hp * 4)
    cost = pl.CostEstimate(flops=flops, transcendentals=int(Ep * Hp),
                           bytes_accessed=bytes_accessed)

    fixed_e = lambda shape: pl.BlockSpec(shape, lambda t, ws: (0, 0))
    aggr_c = pl.pallas_call(
        functools.partial(_edge_kernel, window=WIN),
        out_shape=jax.ShapeDtypeStruct((Npc, Hp), F32),
        grid_spec=pltpu.PrefetchScalarGridSpec(
            num_scalar_prefetch=1,
            grid=(n_tiles,),
            in_specs=[
                pl.BlockSpec((tE, De), lambda t, ws: (t, 0)),      # edge_attr tile
                pl.BlockSpec((tE, 2 * Hp), lambda t, ws: (t, 0)),  # gathered node_side
                pl.BlockSpec((1, tE), lambda t, ws: (0, t)),       # compacted row ranks
                fixed_e((De, 2 * Hp)), fixed_e((1, Hp)),           # fused edge/gate L1
                fixed_e((Hp, Hp)), fixed_e((1, Hp)),               # edge MLP L2
                fixed_e((Hp, Hp)), fixed_e((1, Hp)),               # msg net
                fixed_e((Hp, Hp)), fixed_e((1, Hp)),               # gate L2
            ],
            out_specs=pl.BlockSpec((Npc, Hp), lambda t, ws: (0, 0)),
        ),
        compiler_params=pltpu.CompilerParams(
            dimension_semantics=("arbitrary",), vmem_limit_bytes=vmem),
        cost_estimate=cost,
    )(win_start, ea_p, ns_e, rank2d,
      w1ef_p, b1e_p, w2e_p, b2e_p, wm_p, bm_p, w2g_p, b2g_p)

    # Map compacted ranks back to node rows (O(N*H) gather; rows with no edges get 0).
    aggr_node = jnp.take(aggr_c, rank_of_node, axis=0)             # (Np, Hp) f32

    # ---- kernel 3: epilogue ----
    out = pl.pallas_call(
        functools.partial(_epilogue_kernel, true_hidden=H),
        out_shape=jax.ShapeDtypeStruct((Np, Dn), F32),
        grid=(Np // tN,),
        in_specs=[
            pl.BlockSpec((tN, Dn), lambda i: (i, 0)),
            pl.BlockSpec((tN, Hp), lambda i: (i, 0)),
            full_n((Dn, Hp)), full_n((1, Hp)),
            full_n((1, Hp)), full_n((1, Hp)),
            full_n((Hp, Dn)), full_n((1, Dn)),
        ],
        out_specs=pl.BlockSpec((tN, Dn), lambda i: (i, 0)),
        compiler_params=pltpu.CompilerParams(
            dimension_semantics=("parallel",), vmem_limit_bytes=vmem),
    )(x_p, aggr_node, wc_p, bc_p, gamma_p, beta_p, wo_p, bo_p)

    return out[:N, :node_dim]


# ---------------------------------------------------------------------------
# Parameters & pure-JAX reference
# ---------------------------------------------------------------------------
def init_params(key, node_dim, edge_dim, hidden_dim):
    keys = iter(jax.random.split(key, 40))

    def linear(din, dout):
        w = jax.random.normal(next(keys), (din, dout), F32) / jnp.sqrt(float(din))
        b = 0.1 * jax.random.normal(next(keys), (1, dout), F32)
        return w, b

    w1n, b1n = linear(node_dim, hidden_dim)
    w2n, b2n = linear(hidden_dim, hidden_dim)
    w1e, b1e = linear(edge_dim, hidden_dim)
    w2e, b2e = linear(hidden_dim, hidden_dim)
    wm, bm = linear(hidden_dim, hidden_dim)
    w1g, b1g = linear(edge_dim + node_dim + 1, hidden_dim)
    w1g_e = w1g[:edge_dim]
    w1g_x = w1g[edge_dim:edge_dim + node_dim]
    w1g_t = w1g[edge_dim + node_dim:]
    w2g, b2g = linear(hidden_dim, hidden_dim)
    wc, bc = linear(node_dim, hidden_dim)
    gamma = jnp.ones((1, hidden_dim), F32)
    beta = jnp.zeros((1, hidden_dim), F32)
    wo, bo = linear(hidden_dim, node_dim)
    return (w1n, b1n, w2n, b2n, w1e, b1e, w2e, b2e, wm, bm,
            w1g_e, w1g_x, w1g_t, b1g, w2g, b2g, wc, bc, gamma, beta, wo, bo)


def node_block_ref(x, edge_index, edge_attr, node_time, params):
    (w1n, b1n, w2n, b2n, w1e, b1e, w2e, b2e, wm, bm,
     w1g_e, w1g_x, w1g_t, b1g, w2g, b2g, wc, bc, gamma, beta, wo, bo) = params
    row, col = edge_index[0], edge_index[1]

    def mlp(h, w1, b1, w2, b2):
        return jnp.maximum(h @ w1 + b1, 0.0) @ w2 + b2

    h_node = mlp(x, w1n, b1n, w2n, b2n)
    h_edge = mlp(edge_attr, w1e, b1e, w2e, b2e)
    msg = (h_edge * h_node[col]) @ wm + bm
    w1g = jnp.concatenate([w1g_e, w1g_x, w1g_t], axis=0)
    gate_in = jnp.concatenate([edge_attr, x[col], node_time[col]], axis=-1)
    gate = mlp(gate_in, w1g, b1g, w2g, b2g)
    msg = msg * jax.nn.sigmoid(gate)
    aggr = jnp.zeros((x.shape[0], msg.shape[1]), F32).at[row].add(msg)
    out = x @ wc + bc + aggr
    mean = out.mean(-1, keepdims=True)
    var = jnp.square(out - mean).mean(-1, keepdims=True)
    out = (out - mean) / jnp.sqrt(var + 1e-5) * gamma + beta
    return jnp.maximum(out, 0.0) @ wo + bo


if __name__ == "__main__":
    N, E = 8, 16
    node_dim, edge_dim, hidden_dim = 16, 8, 32

    key = jax.random.PRNGKey(0)
    k_x, k_ea, k_t, k_ei, k_p = jax.random.split(key, 5)

    x = jax.random.normal(k_x, (N, node_dim), F32)
    edge_attr = jax.random.normal(k_ea, (E, edge_dim), F32)
    node_time = jax.random.uniform(k_t, (N, 1), F32)
    edge_index = jax.random.randint(k_ei, (2, E), 0, N, jnp.int32)
    params = init_params(k_p, node_dim, edge_dim, hidden_dim)

    out = node_block_forward(x, edge_index, edge_attr, node_time, params)
    out = jax.block_until_ready(out)

    ref = node_block_ref(x, edge_index, edge_attr, node_time, params)
    assert out.shape == (N, node_dim)
    # bf16 MXU operands with f32 accumulation -> loosen tolerance vs the f32 reference
    assert jnp.allclose(out, ref, rtol=5e-2, atol=5e-2), "mismatch vs JAX reference"

    print("KERNEL_OK")
</pallas_src>

<mosaic_0001>
module attributes {stable_mosaic.version = 11 : i64} {
  func.func @_node_side_kernel(%arg0: i32, %arg1: memref<8x128xf32, #tpu.memory_space<vmem>>, %arg2: memref<8x1xf32, #tpu.memory_space<vmem>>, %arg3: memref<128x256xbf16, #tpu.memory_space<vmem>>, %arg4: memref<1x128xf32, #tpu.memory_space<vmem>>, %arg5: memref<128x128xbf16, #tpu.memory_space<vmem>>, %arg6: memref<1x128xf32, #tpu.memory_space<vmem>>, %arg7: memref<1x128xf32, #tpu.memory_space<vmem>>, %arg8: memref<1x128xf32, #tpu.memory_space<vmem>>, %arg9: memref<8x256xbf16, #tpu.memory_space<vmem>>) attributes {dimension_semantics = [#tpu.dimension_semantics<parallel>], iteration_bounds = array<i64: 1>, scalar_prefetch = 0 : i64, scratch_operands = 0 : i64, tpu.core_type = #tpu.core_type<tc>, window_params = [{transform_indices = @transform_0, window_bounds = array<i64: 8, 128>}, {transform_indices = @transform_1, window_bounds = array<i64: 8, 1>}, {pipeline_mode = #tpu.pipeline_mode<synchronous>, transform_indices = @transform_2, window_bounds = array<i64: 128, 256>}, {pipeline_mode = #tpu.pipeline_mode<synchronous>, transform_indices = @transform_3, window_bounds = array<i64: 1, 128>}, {pipeline_mode = #tpu.pipeline_mode<synchronous>, transform_indices = @transform_4, window_bounds = array<i64: 128, 128>}, {pipeline_mode = #tpu.pipeline_mode<synchronous>, transform_indices = @transform_5, window_bounds = array<i64: 1, 128>}, {pipeline_mode = #tpu.pipeline_mode<synchronous>, transform_indices = @transform_6, window_bounds = array<i64: 1, 128>}, {pipeline_mode = #tpu.pipeline_mode<synchronous>, transform_indices = @transform_7, window_bounds = array<i64: 1, 128>}, {transform_indices = @transform_8, window_bounds = array<i64: 8, 256>}]} {
    %c0 = arith.constant 0 : index
    %c0_0 = arith.constant 0 : index
    %0 = vector.load %arg1[%c0, %c0_0] : memref<8x128xf32, #tpu.memory_space<vmem>>, vector<8x128xf32>
    %1 = arith.truncf %0 : vector<8x128xf32> to vector<8x128xbf16>
    %c0_1 = arith.constant 0 : index
    %c0_2 = arith.constant 0 : index
    %2 = vector.load %arg3[%c0_1, %c0_2] : memref<128x256xbf16, #tpu.memory_space<vmem>>, vector<128x256xbf16>
    %cst = arith.constant dense<0.000000e+00> : vector<8x256xf32>
    %3 = tpu.matmul %1, %2, %cst {dimension_numbers = #tpu.dot_dimension_numbers<[1], [0], [0], [1], [0, 0, 1, 1], [], []>} : vector<8x128xbf16>, vector<128x256xbf16>, vector<8x256xf32> -> vector<8x256xf32>
    %4 = vector.extract_strided_slice %3 {offsets = [0, 0], sizes = [8, 128], strides = [1, 1]} : vector<8x256xf32> to vector<8x128xf32>
    %c0_3 = arith.constant 0 : index
    %c0_4 = arith.constant 0 : index
    %5 = vector.load %arg4[%c0_3, %c0_4] : memref<1x128xf32, #tpu.memory_space<vmem>>, vector<1x128xf32>
    %6 = vector.broadcast %5 : vector<1x128xf32> to vector<8x128xf32>
    %7 = arith.addf %4, %6 : vector<8x128xf32>
    %cst_5 = arith.constant 0.000000e+00 : f32
    %8 = vector.broadcast %cst_5 : f32 to vector<8x128xf32>
    %9 = arith.maximumf %7, %8 : vector<8x128xf32>
    %10 = arith.truncf %9 : vector<8x128xf32> to vector<8x128xbf16>
    %c0_6 = arith.constant 0 : index
    %c0_7 = arith.constant 0 : index
    %11 = vector.load %arg5[%c0_6, %c0_7] : memref<128x128xbf16, #tpu.memory_space<vmem>>, vector<128x128xbf16>
    %cst_8 = arith.constant dense<0.000000e+00> : vector<8x128xf32>
    %12 = tpu.matmul %10, %11, %cst_8 {dimension_numbers = #tpu.dot_dimension_numbers<[1], [0], [0], [1], [0, 0, 1, 1], [], []>} : vector<8x128xbf16>, vector<128x128xbf16>, vector<8x128xf32> -> vector<8x128xf32>
    %c0_9 = arith.constant 0 : index
    %c0_10 = arith.constant 0 : index
    %13 = vector.load %arg6[%c0_9, %c0_10] : memref<1x128xf32, #tpu.memory_space<vmem>>, vector<1x128xf32>
    %14 = vector.broadcast %13 : vector<1x128xf32> to vector<8x128xf32>
    %15 = arith.addf %12, %14 : vector<8x128xf32>
    %16 = vector.extract_strided_slice %3 {offsets = [0, 128], sizes = [8, 128], strides = [1, 1]} : vector<8x256xf32> to vector<8x128xf32>
    %c0_11 = arith.constant 0 : index
    %c0_12 = arith.constant 0 : index
    %17 = vector.load %arg2[%c0_11, %c0_12] : memref<8x1xf32, #tpu.memory_space<vmem>>, vector<8x1xf32>
    %c0_13 = arith.constant 0 : index
    %c0_14 = arith.constant 0 : index
    %18 = vector.load %arg7[%c0_13, %c0_14] : memref<1x128xf32, #tpu.memory_space<vmem>>, vector<1x128xf32>
    %19 = vector.broadcast %17 : vector<8x1xf32> to vector<8x128xf32>
    %20 = vector.broadcast %18 : vector<1x128xf32> to vector<8x128xf32>
    %21 = arith.mulf %19, %20 : vector<8x128xf32>
    %22 = arith.addf %16, %21 : vector<8x128xf32>
    %c0_15 = arith.constant 0 : index
    %c0_16 = arith.constant 0 : index
    %23 = vector.load %arg8[%c0_15, %c0_16] : memref<1x128xf32, #tpu.memory_space<vmem>>, vector<1x128xf32>
    %24 = vector.broadcast %23 : vector<1x128xf32> to vector<8x128xf32>
    %25 = arith.addf %22, %24 : vector<8x128xf32>
    %26 = arith.truncf %15 : vector<8x128xf32> to vector<8x128xbf16>
    %c0_17 = arith.constant 0 : index
    %c0_18 = arith.constant 0 : index
    %27 = vector.load %arg9[%c0_17, %c0_18] : memref<8x256xbf16, #tpu.memory_space<vmem>>, vector<8x128xbf16>
    tpu.vector_store %arg9[%c0_17, %c0_18], %26 {strides = array<i32>} : memref<8x256xbf16, #tpu.memory_space<vmem>>, vector<8x128xbf16>,
    %28 = arith.truncf %25 : vector<8x128xf32> to vector<8x128xbf16>
    %c0_19 = arith.constant 0 : index
    %c128 = arith.constant 128 : index
    %29 = vector.load %arg9[%c0_19, %c128] : memref<8x256xbf16, #tpu.memory_space<vmem>>, vector<8x128xbf16>
    tpu.vector_store %arg9[%c0_19, %c128], %28 {strides = array<i32>} : memref<8x256xbf16, #tpu.memory_space<vmem>>, vector<8x128xbf16>,
    return
  }
  func.func @transform_0(%arg0: i32) -> (i32, i32) {
    %c0_i32 = arith.constant 0 : i32
    %c0_i32_0 = arith.constant 0 : i32
    return %arg0, %c0_i32 : i32, i32
  }
  func.func @transform_1(%arg0: i32) -> (i32, i32) {
    %c0_i32 = arith.constant 0 : i32
    %c0_i32_0 = arith.constant 0 : i32
    return %arg0, %c0_i32 : i32, i32
  }
  func.func @transform_2(%arg0: i32) -> (i32, i32) {
    %c0_i32 = arith.constant 0 : i32
    %c0_i32_0 = arith.constant 0 : i32
    %c0_i32_1 = arith.constant 0 : i32
    return %c0_i32, %c0_i32_0 : i32, i32
  }
  func.func @transform_3(%arg0: i32) -> (i32, i32) {
    %c0_i32 = arith.constant 0 : i32
    %c0_i32_0 = arith.constant 0 : i32
    %c0_i32_1 = arith.constant 0 : i32
    return %c0_i32, %c0_i32_0 : i32, i32
  }
  func.func @transform_4(%arg0: i32) -> (i32, i32) {
    %c0_i32 = arith.constant 0 : i32
    %c0_i32_0 = arith.constant 0 : i32
    %c0_i32_1 = arith.constant 0 : i32
    return %c0_i32, %c0_i32_0 : i32, i32
  }
  func.func @transform_5(%arg0: i32) -> (i32, i32) {
    %c0_i32 = arith.constant 0 : i32
    %c0_i32_0 = arith.constant 0 : i32
    %c0_i32_1 = arith.constant 0 : i32
    return %c0_i32, %c0_i32_0 : i32, i32
  }
  func.func @transform_6(%arg0: i32) -> (i32, i32) {
    %c0_i32 = arith.constant 0 : i32
    %c0_i32_0 = arith.constant 0 : i32
    %c0_i32_1 = arith.constant 0 : i32
    return %c0_i32, %c0_i32_0 : i32, i32
  }
  func.func @transform_7(%arg0: i32) -> (i32, i32) {
    %c0_i32 = arith.constant 0 : i32
    %c0_i32_0 = arith.constant 0 : i32
    %c0_i32_1 = arith.constant 0 : i32
    return %c0_i32, %c0_i32_0 : i32, i32
  }
  func.func @transform_8(%arg0: i32) -> (i32, i32) {
    %c0_i32 = arith.constant 0 : i32
    %c0_i32_0 = arith.constant 0 : i32
    return %arg0, %c0_i32 : i32, i32
  }
}

</mosaic_0001>

<bundles_post_ra>
// kernel: tpu_custom_call.1
= control target key start
LH: loop header
LB: loop body
LE: loop exit
PB: predicated region body
PF: predicated region fallthrough
CT: control target
= control target key end

     0   :  { %13 = vsyncpa [#allocation3], 0  ;;  %s657_s0 = inlined_call_operand.vmem [shape: f32[8,128], index: 0, kind: input, shape index: {}]   ;;  %s658_s1 = inlined_call_operand.vmem [shape: f32[8,1], index: 1, kind: input, shape index: {}]   ;;  %s659_s2 = inlined_call_operand.hbm [shape: bf16[128,256], index: 2, kind: input, shape index: {}]   ;;  %s660_s3 = inlined_call_operand.vmem [shape: f32[1,128], index: 3, kind: input, shape index: {}]   ;;  %s661_s4 = inlined_call_operand.hbm [shape: bf16[128,128], index: 4, kind: input, shape index: {}]   ;;  %s662_s5 = inlined_call_operand.vmem [shape: f32[1,128], index: 5, kind: input, shape index: {}]   ;;  %s663_s6 = inlined_call_operand.vmem [shape: f32[1,128], index: 6, kind: input, shape index: {}]   ;;  %s664_s7 = inlined_call_operand.vmem [shape: f32[1,128], index: 7, kind: input, shape index: {}]   ;;  %s665_s8 = inlined_call_operand.hbm [shape: bf16[8,256], index: 8, kind: output, shape index: {}]  }
   0x1   :  { %14 = vsyncpa [#allocation6], 0 }
   0x2   :  { %15 = vsyncpa [#allocation4], 0  ;;  %s539_s27 = smov [#allocation2]   ;;  %s467_s9 = scalar_lea.hbm %s659_s2, 2048 }
   0x3   :  { %s25_s28 = sshll.u32 %s539_s27, 4  ;;  %p468_p0 = scmp.ne.s32.totalorder %s659_s2, %s467_s9  ;;  %s26_s28 = int_to_ptr.vmem [resolvable:$true] %s25_s28 }
   0x4   :  { %p471_p1 = scmp.lt.u32.totalorder %s467_s9, %s659_s2 }
   0x6   :  { %p473_p2 = pnand %p471_p1, %p468_p0 }
   0x8   :  { %476 = shalt.err (!%p473_p2)
}
   0x9   :  { %s477_s14 = scalar_lea.vmem %s26_s28, 2048  ;;  %p482_p4 = scmp.lt.s32.totalorder %s26_s28, %s26_s28 }
   0xa   :  { %p478_p3 = scmp.ne.s32.totalorder %s26_s28, %s477_s14  ;;  %p483_p5 = scmp.lt.s32.totalorder %s477_s14, %s477_s14 }
   0xc   :  { %p484_p6 = por %p483_p5, %p482_p4 }
   0xe   :  { %p485_p7 = pnand %p484_p6, %p478_p3 }
  0x10   :  { %488 = shalt.err (!%p485_p7)
}
  0x11   :  { %s540_s15 = smov 128   ;;  %s541_s16 = smov 8  }
  0x12   :  { %31 = dma.hbm_to_vmem [thread:$0]  %s659_s2, 2048, %s26_s28, [#allocation3], %s540_s15, %s540_s15, %s541_s16  }
  0x13   :  { %s542_s19 = smov [#allocation5]   ;;  %s489_s23 = scalar_lea.hbm %s661_s4, 1024 }
  0x14   :  { %s39_s20 = sshll.u32 %s542_s19, 4  ;;  %p490_p8 = scmp.ne.s32.totalorder %s661_s4, %s489_s23  ;;  %s40_s20 = int_to_ptr.vmem [resolvable:$true] %s39_s20 }
  0x15   :  { %p493_p9 = scmp.lt.u32.totalorder %s489_s23, %s661_s4 }
  0x17   :  { %p495_p10 = pnand %p493_p9, %p490_p8 }
  0x19   :  { %498 = shalt.err (!%p495_p10)
}
  0x1a   :  { %s499_s29 = scalar_lea.vmem %s40_s20, 1024  ;;  %p504_p12 = scmp.lt.s32.totalorder %s40_s20, %s40_s20 }
  0x1b   :  { %p500_p11 = scmp.ne.s32.totalorder %s40_s20, %s499_s29  ;;  %p505_p13 = scmp.lt.s32.totalorder %s499_s29, %s499_s29 }
  0x1d   :  { %p506_p0 = por %p505_p13, %p504_p12 }
  0x1f   :  { %p507_p1 = pnand %p506_p0, %p500_p11 }
  0x21   :  { %510 = shalt.err (!%p507_p1)
}
  0x22   :  { %s543_s2 = smov 64   ;;  %s544_s28 = smov 4  }
  0x23   :  { %45 = dma.hbm_to_vmem [thread:$0]  %s661_s4, 1024, %s40_s20, [#allocation6], %s543_s2, %s543_s2, %s544_s28  }
  0x24   :  { %533 = dma.done.wait [#allocation3], 2048  }
  0x25   :  { %534 = vsyncadd [#allocation3], 4294965248 }
  0x26   :  { %535 = dma.done.wait [#allocation6], 1024  }
  0x27   :  { %536 = vsyncadd [#allocation6], 4294966272  ;;  %v545_v0 = vmov 0   ;;  %v546_v1 = vmov 0.0   ;;  %v435_v2 = vld [vmem:[#allocation2 + $0x4] ss:$8 sps:$4 sm:$0xff]  }
  0x28   :  { %189 = vmatprep.mubr.bf16.mxu0 %v545_v0  ;;  %434 = vset.pattern.permute.xlu0 %v545_v0  ;;  %v437_v3 = vld [vmem:[#allocation2] ss:$8 sps:$4 sm:$0xff]   ;;  %v438_v4 = vld [vmem:[#allocation2 + $0x14] ss:$8 sps:$4 sm:$0xff]   ;;  %v440_v5 = vld [vmem:[#allocation2 + $0x10] ss:$8 sps:$4 sm:$0xff]  }
  0x29   :  { %404 = vmatprep.subr.bf16.mxu1 %v546_v1  ;;  %157 = vmatprep.subr.bf16.mxu0 %v435_v2  ;;  %v441_v6 = vld [vmem:[#allocation2 + $0x24] ss:$8 sps:$4 sm:$0xff]   ;;  %v443_v7 = vld [vmem:[#allocation2 + $0x20] ss:$8 sps:$4 sm:$0xff]   ;;  %v444_v8 = vld [vmem:[#allocation2 + $0x34] ss:$8 sps:$4 sm:$0xff]  }
  0x2a   :  { %158 = vmatpush1.bf16.msra.mxu0 %v437_v3  ;;  %v446_v9 = vld [vmem:[#allocation2 + $0x30] ss:$8 sps:$4 sm:$0xff]   ;;  %v447_v10 = vld [vmem:[#allocation2 + $0x44] ss:$8 sps:$4 sm:$0xff]   ;;  %v449_v14 = vld [vmem:[#allocation2 + $0x40] ss:$8 sps:$4 sm:$0xff]  }
  0x2b   :  { %159 = vmatprep.subr.bf16.mxu0 %v438_v4  ;;  %v319_v11 = vld [vmem:[%s658_s1] sm:$0xff]  ;;  %v460_v13 = vld [vmem:[#allocation5 + $0x8] sm:$0xff]   ;;  %v450_v15 = vld [vmem:[#allocation2 + $0x54] ss:$8 sps:$4 sm:$0xff]   ;;  %vm547_vm0 = vmmov 0   ;;  %s548_s18 = smov [#allocation7]  }
  0x2c   :  { %323 = vperm.xlu0 %434, %v319_v11   ;;  %v459_v12 = vld [vmem:[#allocation5] sm:$0xff]   ;;  %v461_v16 = vld [vmem:[#allocation5 + $0x10] sm:$0xff]   ;;  %v462_v19 = vld [vmem:[#allocation5 + $0x18] sm:$0xff]   ;;  %420 = vmatprep.mubr.msk.bf16.mxu1 %vm547_vm0, %v546_v1  ;;  %s352_s19 = sshll.u32 %s548_s18, 4  ;;  %s353_s19 = int_to_ptr.vmem [resolvable:$true] %s352_s19 }
  0x2d   :  { %405 = vmatpush3.bf16.msra.mxu1 %v459_v12  ;;  %v452_v17 = vld [vmem:[#allocation2 + $0x50] ss:$8 sps:$4 sm:$0xff]   ;;  %v453_v18 = vld [vmem:[#allocation2 + $0x64] ss:$8 sps:$4 sm:$0xff]   ;;  %v455_v20 = vld [vmem:[#allocation2 + $0x60] ss:$8 sps:$4 sm:$0xff]   ;;  %p516_p3 = scmp.lt.s32.totalorder %s353_s19, %s353_s19 }
  0x2e   :  { %160 = vmatpush1.bf16.msra.mxu0 %v440_v5  ;;  %406 = vmatprep.subr.bf16.mxu1 %v546_v1  ;;  %v456_v21 = vld [vmem:[#allocation2 + $0x74] ss:$8 sps:$4 sm:$0xff]   ;;  %v463_v22 = vld [vmem:[#allocation5 + $0x20] sm:$0xff]   ;;  %v458_v23 = vld [vmem:[#allocation2 + $0x70] ss:$8 sps:$4 sm:$0xff]  }
  0x2f   :  { %161 = vmatprep.subr.bf16.mxu0 %v441_v6  ;;  %v59_v24 = vld [vmem:[%s657_s0] sm:$0xff]  ;;  %v464_v26 = vld [vmem:[#allocation5 + $0x28] sm:$0xff]   ;;  %v465_v27 = vld [vmem:[#allocation5 + $0x30] sm:$0xff]  }
  0x30   :  { %v60_v25 = vpack.c.bf16 %v59_v24, %v59_v24  ;;  %v466_v28 = vld [vmem:[#allocation5 + $0x38] sm:$0xff]   ;;  %v378_v29 = vld [vmem:[%s660_s3] ss:$0 sm:$0xff] }
  0x31   :  { %407 = vmatpush3.bf16.msra.mxu1 %v460_v13  ;;  %v388_v37 = vld [vmem:[%s663_s6] ss:$0 sm:$0xff]  ;;  %s511_s6 = scalar_lea.vmem %s353_s19, 128 }
  0x32   :  { %162 = vmatpush1.bf16.msra.mxu0 %v443_v7  ;;  %408 = vmatprep.subr.bf16.mxu1 %v546_v1  ;;  %v389_v41 = vld [vmem:[%s664_s7] ss:$0 sm:$0xff]  ;;  %p512_p2 = scmp.ne.s32.totalorder %s353_s19, %s511_s6  ;;  %p517_p4 = scmp.lt.s32.totalorder %s511_s6, %s511_s6 }
  0x33   :  { %163 = vmatprep.subr.bf16.mxu0 %v444_v8  ;;  %v379_v42 = vld [vmem:[%s662_s5] ss:$0 sm:$0xff] }
  0x34   :  { %p518_p5 = por %p517_p4, %p516_p3 }
  0x35   :  { %409 = vmatpush3.bf16.msra.mxu1 %v461_v16 }
  0x36   :  { %164 = vmatpush1.bf16.msra.mxu0 %v446_v9  ;;  %410 = vmatprep.subr.bf16.mxu1 %v546_v1  ;;  %p519_p6 = pnand %p518_p5, %p512_p2 }
  0x37   :  { %165 = vmatprep.subr.bf16.mxu0 %v447_v10 }
  0x39   :  { %411 = vmatpush3.bf16.msra.mxu1 %v462_v19 }
  0x3a   :  { %166 = vmatpush1.bf16.msra.mxu0 %v449_v14  ;;  %412 = vmatprep.subr.bf16.mxu1 %v546_v1 }
  0x3b   :  { %167 = vmatprep.subr.bf16.mxu0 %v450_v15 }
  0x3d   :  { %413 = vmatpush3.bf16.msra.mxu1 %v463_v22 }
  0x3e   :  { %168 = vmatpush1.bf16.msra.mxu0 %v452_v17  ;;  %414 = vmatprep.subr.bf16.mxu1 %v546_v1 }
  0x3f   :  { %169 = vmatprep.subr.bf16.mxu0 %v453_v18 }
  0x41   :  { %415 = vmatpush3.bf16.msra.mxu1 %v464_v26 }
  0x42   :  { %170 = vmatpush1.bf16.msra.mxu0 %v455_v20  ;;  %416 = vmatprep.subr.bf16.mxu1 %v546_v1 }
  0x43   :  { %171 = vmatprep.subr.bf16.mxu0 %v456_v21 }
  0x45   :  { %417 = vmatpush3.bf16.msra.mxu1 %v465_v27 }
  0x46   :  { %172 = vmatpush1.bf16.msra.mxu0 %v458_v23  ;;  %418 = vmatprep.subr.bf16.mxu1 %v546_v1 }
  0x49   :  { %190 = vmatmul.mubr.bf16.vlgmr.msra.gmra.mrb[0].mxu0 %v60_v25  ;;  %419 = vmatpush3.bf16.msra.mxu1 %v466_v28 }
  0xab   :  { %v324_v38 = vpop.permute.xlu0 %323 }
  0xac   :  { %v332_v39 = vmul.f32 %v388_v37, %v324_v38 }
 0x11c   :  { %v191_v30 = vpop.f32.mrb[0].mxu0 }
 0x11d   :  { %v205_v31 = vadd.f32 %v378_v29, %v191_v30  ;;  %v193_v32 = vpop.f32.mrb[1].mxu0 }
 0x11e   :  { %v195_v33 = vpop.f32.mrb[2].mxu0  ;;  %v333_v40 = vadd.f32 %v332_v39, %v193_v32 }
 0x11f   :  { %v206_v34 = vmax.f32 %v205_v31, 0.0  ;;  %v196_v35 = vpop.f32.mrb[3].mxu0 }
 0x120   :  { %v341_v44 = vadd.f32 %v389_v41, %v333_v40 }
 0x121   :  { %v207_v36 = vpack.c.bf16 %v206_v34, %v206_v34 }
 0x123   :  { %421 = vmatmul.mubr.bf16.vlgmr.msra.gmra.mrb[0].mxu1 %v207_v36 }
 0x1f6   :  { %v313_v43 = vpop.f32.mrb[0].mxu1 }
 0x1f7   :  { %v314_v45 = vadd.f32 %v379_v42, %v313_v43  ;;  %v422_v46 = vpop.f32.mrb[1].mxu1 }
 0x1f8   :  { %v316_v47 = vpop.f32.mrb[2].mxu1 }
 0x1f9   :  { %v393_v48 = vpack.c.bf16 %v341_v44, %v314_v45  ;;  %v423_v49 = vpop.f32.mrb[3].mxu1 }
 0x1fb   :  { %394 = vst [vmem:[#allocation7] sm:$0xff] %v393_v48  }
 0x1fc   :  { %522 = shalt.err (!%p519_p6)
}
 0x1fd   :  { %s523_s20 = scalar_lea.hbm %s665_s8, 128 }
 0x1fe   :  { %p524_p7 = scmp.ne.s32.totalorder %s665_s8, %s523_s20  ;;  %p527_p8 = scmp.lt.u32.totalorder %s523_s20, %s665_s8 }
 0x200   :  { %p529_p9 = pnand %p527_p8, %p524_p7 }
 0x202   :  { %532 = shalt.err (!%p529_p9)
}
 0x203   :  { %355 = dma.vmem_to_hbm [thread:$0]  %s353_s19, 128, %s665_s8, [#allocation4]  }
 0x204   :  { %537 = dma.done.wait [#allocation4], 128  }
 0x205   :  { %538 = vsyncadd [#allocation4], 4294967168 }
 0x206   :  { %359 = vsyncpa [#allocation3], 1 }
 0x207   :  { %360 = vsyncpa [#allocation6], 1 }
 0x208   :  { %361 = vsyncpa [#allocation4], 1 }

</bundles_post_ra>
